<compile_context>
chip_gen: v6e
topology: v6e:2x2x1
jax: 0.10.0
libtpu: 0.0.40
codegen_flags: <defaults>
</compile_context>

<pallas_src>
import jax
import jax.numpy as jnp
from jax.experimental import pallas as pl
from jax.experimental.pallas import tpu as pltpu


_LANES = 1024                    # 8 * 128: lane-dense, layout-friendly last dim
_TARGET_BLOCK_BYTES = 2 << 20    # ~2 MiB block; 2 bufs * (in + out) = ~8 MiB VMEM
                                 # -> safe under the 16 MiB scoped default on v5e
                                 #    (and comfortably under v6e/v7x limits)


def _neg_scale_kernel(coeff_ref, g_ref, o_ref):
    # grad_input = -coeff * grad_output, elementwise.  coeff lives in SMEM (runtime scalar).
    scale = (-coeff_ref[0]).astype(g_ref.dtype)
    o_ref[...] = g_ref[...] * scale


def _neg_scale(g, coeff):
    """Compute -coeff * g with a tiled, pipelined Pallas kernel (any shape/dtype)."""
    orig_shape = g.shape
    dtype = g.dtype
    n = g.size

    flat = g.reshape(-1)
    # Pad (only if needed) so the flat length is a multiple of the lane width.
    pad = (-n) % _LANES
    if pad:
        flat = jnp.pad(flat, (0, pad))
    rows = flat.size // _LANES
    x2 = flat.reshape(rows, _LANES)

    # Block rows: multiple of 8 sublanes, sized for ~2 MiB blocks.
    itemsize = jnp.dtype(dtype).itemsize
    target_rows = max(8, _TARGET_BLOCK_BYTES // (_LANES * itemsize))
    target_rows -= target_rows % 8
    if rows <= target_rows:
        tile_rows = rows          # single full-extent block along rows (always legal)
    else:
        tile_rows = target_rows   # boundary block (if any) is masked by Pallas

    grid = (pl.cdiv(rows, tile_rows),)
    coeff_arr = jnp.asarray(coeff, jnp.float32).reshape((1,))

    out2 = pl.pallas_call(
        _neg_scale_kernel,
        out_shape=jax.ShapeDtypeStruct((rows, _LANES), dtype),
        grid=grid,
        in_specs=[
            pl.BlockSpec(memory_space=pltpu.MemorySpace.SMEM),       # coeff scalar
            pl.BlockSpec((tile_rows, _LANES), lambda i: (i, 0)),     # grad slab
        ],
        out_specs=pl.BlockSpec((tile_rows, _LANES), lambda i: (i, 0)),
        compiler_params=pltpu.CompilerParams(
            dimension_semantics=("parallel",),
        ),
    )(coeff_arr, x2)

    out_flat = out2.reshape(-1)
    if pad:
        out_flat = out_flat[:n]
    return out_flat.reshape(orig_shape)


@jax.custom_vjp
def _grl(x, coeff):
    # Forward of GradientReverseFunction: output = input * 1.0 -> identity.
    # Pure pass-through: zero HBM traffic, zero kernel launches.
    return x


def _grl_fwd(x, coeff):
    return x, coeff


def _grl_bwd(coeff, g):
    # Backward of GradientReverseFunction: grad_input = -coeff * grad_output,
    # no gradient flows to coeff (PyTorch returns None; here a zero cotangent).
    return _neg_scale(g, coeff), jnp.zeros_like(coeff)


_grl.defvjp(_grl_fwd, _grl_bwd)


def gradient_reverse_layer(x, coeff=1.0):
    """GradientReverseLayer.forward: identity fwd, -coeff-scaled grad in bwd."""
    return _grl(x, jnp.asarray(coeff, dtype=jnp.float32))


if __name__ == "__main__":
    key = jax.random.PRNGKey(0)
    # NCHW like the PyTorch module: batch=2, channels=4, spatial=16.
    x = jax.random.normal(key, (2, 4, 16, 16), dtype=jnp.float32)

    # Forward: identity (no kernel needed -- pure pass-through).
    y = jax.block_until_ready(gradient_reverse_layer(x, 1.0))
    assert y.shape == x.shape and y.dtype == x.dtype
    assert bool(jnp.allclose(y, x)), "forward must be identity"

    # Backward through the Pallas kernel: d/dx sum(GRL(x)) == -coeff.
    coeff = 0.5
    g = jax.grad(lambda a: jnp.sum(gradient_reverse_layer(a, coeff)))(x)
    g = jax.block_until_ready(g)
    assert bool(jnp.allclose(g, -coeff * jnp.ones_like(x))), "backward must be -coeff * grad"

    # Exercise the kernel with a non-trivial upstream gradient and a traced coeff
    # (runtime scalar -> same compiled kernel for any coeff value).
    g_up = jax.random.normal(jax.random.PRNGKey(1), x.shape, dtype=jnp.float32)
    _, vjp_fn = jax.vjp(lambda a: gradient_reverse_layer(a, jnp.float32(0.25)), x)
    (gx,) = vjp_fn(g_up)
    gx = jax.block_until_ready(gx)
    assert bool(jnp.allclose(gx, -0.25 * g_up, atol=1e-6)), "kernel must compute -coeff * g"

    print("KERNEL_OK")
</pallas_src>

<mosaic_0001>
module attributes {stable_mosaic.version = 11 : i64} {
  func.func @_neg_scale_kernel(%arg0: i32, %arg1: memref<1xf32, #tpu.memory_space<smem>>, %arg2: memref<2x1024xf32, #tpu.memory_space<vmem>>, %arg3: memref<2x1024xf32, #tpu.memory_space<vmem>>) attributes {dimension_semantics = [#tpu.dimension_semantics<parallel>], iteration_bounds = array<i64: 1>, scalar_prefetch = 0 : i64, scratch_operands = 0 : i64, tpu.core_type = #tpu.core_type<tc>, window_params = [{transform_indices = @transform_0, window_bounds = array<i64: 1>}, {transform_indices = @transform_1, window_bounds = array<i64: 2, 1024>}, {transform_indices = @transform_2, window_bounds = array<i64: 2, 1024>}]} {
    %c0 = arith.constant 0 : index
    %0 = memref.load %arg1[%c0] : memref<1xf32, #tpu.memory_space<smem>>
    %cst = arith.constant 0.000000e+00 : f32
    %1 = arith.subf %cst, %0 : f32
    %c0_0 = arith.constant 0 : index
    %c0_1 = arith.constant 0 : index
    %2 = vector.load %arg2[%c0_0, %c0_1] : memref<2x1024xf32, #tpu.memory_space<vmem>>, vector<2x1024xf32>
    %3 = vector.broadcast %1 : f32 to vector<2x1024xf32>
    %4 = arith.mulf %2, %3 : vector<2x1024xf32>
    %c0_2 = arith.constant 0 : index
    %c0_3 = arith.constant 0 : index
    %5 = vector.load %arg3[%c0_2, %c0_3] : memref<2x1024xf32, #tpu.memory_space<vmem>>, vector<2x1024xf32>
    tpu.vector_store %arg3[%c0_2, %c0_3], %4 {strides = array<i32>} : memref<2x1024xf32, #tpu.memory_space<vmem>>, vector<2x1024xf32>,
    return
  }
  func.func @transform_0(%arg0: i32) -> i32 {
    %c0_i32 = arith.constant 0 : i32
    %c0_i32_0 = arith.constant 0 : i32
    return %c0_i32 : i32
  }
  func.func @transform_1(%arg0: i32) -> (i32, i32) {
    %c0_i32 = arith.constant 0 : i32
    %c0_i32_0 = arith.constant 0 : i32
    return %arg0, %c0_i32 : i32, i32
  }
  func.func @transform_2(%arg0: i32) -> (i32, i32) {
    %c0_i32 = arith.constant 0 : i32
    %c0_i32_0 = arith.constant 0 : i32
    return %arg0, %c0_i32 : i32, i32
  }
}

</mosaic_0001>

<bundles_post_ra>
// kernel: tpu_custom_call.1
= control target key start
LH: loop header
LB: loop body
LE: loop exit
PB: predicated region body
PF: predicated region fallthrough
CT: control target
= control target key end

     0   :  { %8 = vsyncpa [#allocation4], 0  ;;  %s121_s0 = inlined_call_operand.<no memory space> [shape: f32[1], index: 0, kind: input, shape index: {}]   ;;  %s122_s1 = inlined_call_operand.hbm [shape: f32[2,1024], index: 1, kind: input, shape index: {}]   ;;  %s123_s2 = inlined_call_operand.hbm [shape: f32[2,1024], index: 2, kind: output, shape index: {}]  }
   0x1   :  { %9 = vsyncpa [#allocation5], 0  ;;  %s95_s9 = smov [#allocation3]  }
   0x2   :  { %s18_s10 = sshll.u32 %s95_s9, 4  ;;  %s19_s10 = int_to_ptr.vmem [resolvable:$true] %s18_s10 }
   0x3   :  { %s59_s11 = scalar_lea.vmem %s19_s10, 256  ;;  %p64_p1 = scmp.lt.s32.totalorder %s19_s10, %s19_s10 }
   0x4   :  { %p60_p0 = scmp.ne.s32.totalorder %s19_s10, %s59_s11  ;;  %p65_p2 = scmp.lt.s32.totalorder %s59_s11, %s59_s11 }
   0x6   :  { %p66_p3 = por %p65_p2, %p64_p1 }
   0x8   :  { %p67_p4 = pnand %p66_p3, %p60_p0 }
   0xa   :  { %70 = shalt.err (!%p67_p4)
}
   0xb   :  { %21 = dma.hbm_to_vmem [thread:$0]  %s122_s1, 256, %s19_s10, [#allocation4]  }
   0xc   :  { %91 = dma.done.wait [#allocation4], 256  }
   0xd   :  { %92 = vsyncadd [#allocation4], 4294967040  ;;  %s26_s16 = ssub.f32 0.0, %s121_s0  ;;  %s96_s17 = smov [#allocation6]   ;;  %v27_v1 = vld [vmem:[#allocation3] sm:$0xff]  ;;  %v28_v2 = vld [vmem:[#allocation3 + $0x8] sm:$0xff] }
   0xe   :  { %s40_s18 = sshll.u32 %s96_s17, 4  ;;  %s41_s18 = int_to_ptr.vmem [resolvable:$true] %s40_s18 }
   0xf   :  { %v29_v0 = vstv %s26_s16  ;;  %s71_s19 = scalar_lea.vmem %s41_s18, 256  ;;  %p76_p6 = scmp.lt.s32.totalorder %s41_s18, %s41_s18 }
  0x10   :  { %v30_v3 = vmul.f32 %v29_v0, %v27_v1  ;;  %v31_v4 = vmul.f32 %v29_v0, %v28_v2  ;;  %p72_p5 = scmp.ne.s32.totalorder %s41_s18, %s71_s19  ;;  %p77_p7 = scmp.lt.s32.totalorder %s71_s19, %s71_s19 }
  0x12   :  { %32 = vst [vmem:[#allocation6] sm:$0xff] %v30_v3  ;;  %33 = vst [vmem:[#allocation6 + $0x8] sm:$0xff] %v31_v4  ;;  %p78_p8 = por %p77_p7, %p76_p6 }
  0x14   :  { %p79_p9 = pnand %p78_p8, %p72_p5 }
  0x16   :  { %82 = shalt.err (!%p79_p9)
}
  0x17   :  { %43 = dma.vmem_to_hbm [thread:$0]  %s41_s18, 256, %s123_s2, [#allocation5]  }
  0x18   :  { %93 = dma.done.wait [#allocation5], 256  }
  0x19   :  { %94 = vsyncadd [#allocation5], 4294967040 }
  0x1a   :  { %47 = vsyncpa [#allocation4], 1 }
  0x1b   :  { %48 = vsyncpa [#allocation5], 1 }

</bundles_post_ra>
